<compile_context>
chip_gen: v6e
topology: v6e:2x2x1
jax: 0.10.0
libtpu: 0.0.40
codegen_flags: <defaults>
</compile_context>

<pallas_src>
import jax
import jax.numpy as jnp
from jax.experimental import pallas as pl
from jax.experimental.pallas import tpu as pltpu


def _eot_head_kernel(x_ref, w_ref, b_ref, o_ref, acc_ref):
    """One K-tile of the (1, FEAT) @ (FEAT, C) head; accumulate in f32 scratch."""
    k = pl.program_id(0)

    @pl.when(k == 0)
    def _():
        acc_ref[...] = jnp.zeros_like(acc_ref)

    # bf16 x bf16 -> f32 accumulate on the MXU.
    acc_ref[...] += jnp.dot(
        x_ref[...], w_ref[...], preferred_element_type=jnp.float32
    )

    @pl.when(k == pl.num_programs(0) - 1)
    def _():
        # Bias added once at finalize (identical to mean(xW + b) over identical rows).
        o_ref[...] = (acc_ref[...] + b_ref[...]).astype(o_ref.dtype)


def eot_wrapper_forward(x_nchw, w, b, eot_steps: int, *, tk: int = 256):
    """x_nchw: (1, 3, H, W) f32; w: (3*H*W, C) f32; b: (1, C) f32. Returns (1, C) f32.

    Semantically equal to: repeat E times -> linear head -> mean over E (keepdim).
    With a deterministic head the mean over identical rows is hoisted to a single GEMV.
    """
    n, c, h, wd = x_nchw.shape
    assert n == 1, "EoTWrapper expects a single image (1, 3, h, w)"
    assert eot_steps >= 1
    feat = c * h * wd
    num_classes = w.shape[1]

    # bf16 operands for the matmul; f32 accumulation inside the kernel.
    x_flat = x_nchw.reshape(1, feat).astype(jnp.bfloat16)
    w_bf16 = w.astype(jnp.bfloat16)

    # K tiling over FEAT (reduction axis -> "arbitrary"); tk multiple of 128.
    tk = min(tk, feat)
    assert feat % tk == 0, "FEAT must be a multiple of the K tile"
    kt = feat // tk

    cost = pl.CostEstimate(
        flops=2 * feat * num_classes,
        transcendentals=0,
        bytes_accessed=(
            feat * num_classes * 2      # W (bf16)
            + feat * 2                  # x (bf16)
            + num_classes * 4 * 2       # b + out (f32)
        ),
    )

    return pl.pallas_call(
        _eot_head_kernel,
        out_shape=jax.ShapeDtypeStruct((1, num_classes), jnp.float32),
        grid_spec=pltpu.PrefetchScalarGridSpec(
            num_scalar_prefetch=0,
            grid=(kt,),
            in_specs=[
                pl.BlockSpec((1, tk), lambda k: (0, k)),                 # x  (1, tk)
                pl.BlockSpec((tk, num_classes), lambda k: (k, 0)),       # W  (tk, C)
                pl.BlockSpec((1, num_classes), lambda k: (0, 0)),        # b  (1, C)
            ],
            out_specs=pl.BlockSpec((1, num_classes), lambda k: (0, 0)),  # out resident
            scratch_shapes=[pltpu.VMEM((1, num_classes), jnp.float32)],
        ),
        compiler_params=pltpu.CompilerParams(
            dimension_semantics=("arbitrary",),  # K is a reduction axis
        ),
        cost_estimate=cost,
    )(x_flat, w_bf16, b)


if __name__ == "__main__":
    key = jax.random.PRNGKey(0)
    k_x, k_w, k_b = jax.random.split(key, 3)

    # Small shapes consistent with the module's forward: x is (1, 3, h, w).
    H = W = 16
    NUM_CLASSES = 128          # multiple of 128 -> lane-dense output stores
    EOT_STEPS = 8
    FEAT = 3 * H * W           # 768, multiple of 128

    x = jax.random.normal(k_x, (1, 3, H, W), dtype=jnp.float32)
    w = jax.random.normal(k_w, (FEAT, NUM_CLASSES), dtype=jnp.float32) * 0.02
    b = jax.random.normal(k_b, (1, NUM_CLASSES), dtype=jnp.float32) * 0.1

    out = eot_wrapper_forward(x, w, b, EOT_STEPS)
    out = jax.block_until_ready(out)

    # Reference: repeat -> model -> mean(dim=0, keepdim=True), in plain JAX (f32).
    x_rep_ref = jnp.tile(x.reshape(1, FEAT), (EOT_STEPS, 1))
    ref = jnp.mean(x_rep_ref @ w + b, axis=0, keepdims=True)

    assert out.shape == (1, NUM_CLASSES)
    # bf16 matmul operands vs. f32 reference -> loose tolerance.
    assert jnp.allclose(out, ref, atol=3e-2, rtol=3e-2)
    print("KERNEL_OK")
</pallas_src>

<mosaic_0001>
module attributes {stable_mosaic.version = 11 : i64} {
  func.func @_eot_head_kernel(%arg0: i32, %arg1: memref<1x256xbf16, #tpu.memory_space<vmem>>, %arg2: memref<256x128xbf16, #tpu.memory_space<vmem>>, %arg3: memref<1x128xf32, #tpu.memory_space<vmem>>, %arg4: memref<1x128xf32, #tpu.memory_space<vmem>>, %arg5: memref<1x128xf32, #tpu.memory_space<vmem>>) attributes {dimension_semantics = [#tpu.dimension_semantics<arbitrary>], iteration_bounds = array<i64: 3>, scalar_prefetch = 0 : i64, scratch_operands = 1 : i64, tpu.core_type = #tpu.core_type<tc>, window_params = [{transform_indices = @transform_0, window_bounds = array<i64: 1, 256>}, {transform_indices = @transform_1, window_bounds = array<i64: 256, 128>}, {pipeline_mode = #tpu.pipeline_mode<synchronous>, transform_indices = @transform_2, window_bounds = array<i64: 1, 128>}, {pipeline_mode = #tpu.pipeline_mode<synchronous>, transform_indices = @transform_3, window_bounds = array<i64: 1, 128>}]} {
    %c0_i32 = arith.constant 0 : i32
    %0 = arith.cmpi eq, %arg0, %c0_i32 : i32
    %1 = arith.extui %0 : i1 to i32
    %c0_i32_0 = arith.constant 0 : i32
    %2 = arith.cmpi ne, %1, %c0_i32_0 : i32
    scf.if %2 {
      %cst_9 = arith.constant 0.000000e+00 : f32
      %12 = vector.broadcast %cst_9 : f32 to vector<1x128xf32>
      %c0_10 = arith.constant 0 : index
      %c0_11 = arith.constant 0 : index
      %13 = vector.load %arg5[%c0_10, %c0_11] : memref<1x128xf32, #tpu.memory_space<vmem>>, vector<1x128xf32>
      tpu.vector_store %arg5[%c0_10, %c0_11], %12 {strides = array<i32>} : memref<1x128xf32, #tpu.memory_space<vmem>>, vector<1x128xf32>,
    } else {
    }
    %c0 = arith.constant 0 : index
    %c0_1 = arith.constant 0 : index
    %3 = vector.load %arg5[%c0, %c0_1] : memref<1x128xf32, #tpu.memory_space<vmem>>, vector<1x128xf32>
    %c0_2 = arith.constant 0 : index
    %c0_3 = arith.constant 0 : index
    %4 = vector.load %arg1[%c0_2, %c0_3] : memref<1x256xbf16, #tpu.memory_space<vmem>>, vector<1x256xbf16>
    %c0_4 = arith.constant 0 : index
    %c0_5 = arith.constant 0 : index
    %5 = vector.load %arg2[%c0_4, %c0_5] : memref<256x128xbf16, #tpu.memory_space<vmem>>, vector<256x128xbf16>
    %cst = arith.constant dense<0.000000e+00> : vector<1x128xf32>
    %6 = tpu.matmul %4, %5, %cst {dimension_numbers = #tpu.dot_dimension_numbers<[1], [0], [0], [1], [0, 0, 1, 1], [], []>} : vector<1x256xbf16>, vector<256x128xbf16>, vector<1x128xf32> -> vector<1x128xf32>
    %7 = arith.addf %3, %6 : vector<1x128xf32>
    %c0_6 = arith.constant 0 : index
    %c0_7 = arith.constant 0 : index
    %8 = vector.load %arg5[%c0_6, %c0_7] : memref<1x128xf32, #tpu.memory_space<vmem>>, vector<1x128xf32>
    tpu.vector_store %arg5[%c0_6, %c0_7], %7 {strides = array<i32>} : memref<1x128xf32, #tpu.memory_space<vmem>>, vector<1x128xf32>,
    %c2_i32 = arith.constant 2 : i32
    %9 = arith.cmpi eq, %arg0, %c2_i32 : i32
    %10 = arith.extui %9 : i1 to i32
    %c0_i32_8 = arith.constant 0 : i32
    %11 = arith.cmpi ne, %10, %c0_i32_8 : i32
    scf.if %11 {
      %c0_9 = arith.constant 0 : index
      %c0_10 = arith.constant 0 : index
      %12 = vector.load %arg5[%c0_9, %c0_10] : memref<1x128xf32, #tpu.memory_space<vmem>>, vector<1x128xf32>
      %c0_11 = arith.constant 0 : index
      %c0_12 = arith.constant 0 : index
      %13 = vector.load %arg3[%c0_11, %c0_12] : memref<1x128xf32, #tpu.memory_space<vmem>>, vector<1x128xf32>
      %14 = arith.addf %12, %13 : vector<1x128xf32>
      %c0_13 = arith.constant 0 : index
      %c0_14 = arith.constant 0 : index
      %15 = vector.load %arg4[%c0_13, %c0_14] : memref<1x128xf32, #tpu.memory_space<vmem>>, vector<1x128xf32>
      tpu.vector_store %arg4[%c0_13, %c0_14], %14 {strides = array<i32>} : memref<1x128xf32, #tpu.memory_space<vmem>>, vector<1x128xf32>,
    } else {
    }
    return
  }
  func.func @transform_0(%arg0: i32) -> (i32, i32) {
    %c0_i32 = arith.constant 0 : i32
    %c0_i32_0 = arith.constant 0 : i32
    return %c0_i32, %arg0 : i32, i32
  }
  func.func @transform_1(%arg0: i32) -> (i32, i32) {
    %c0_i32 = arith.constant 0 : i32
    %c0_i32_0 = arith.constant 0 : i32
    return %arg0, %c0_i32 : i32, i32
  }
  func.func @transform_2(%arg0: i32) -> (i32, i32) {
    %c0_i32 = arith.constant 0 : i32
    %c0_i32_0 = arith.constant 0 : i32
    %c0_i32_1 = arith.constant 0 : i32
    return %c0_i32, %c0_i32_0 : i32, i32
  }
  func.func @transform_3(%arg0: i32) -> (i32, i32) {
    %c0_i32 = arith.constant 0 : i32
    %c0_i32_0 = arith.constant 0 : i32
    %c0_i32_1 = arith.constant 0 : i32
    return %c0_i32, %c0_i32_0 : i32, i32
  }
}

</mosaic_0001>

<bundles_post_ra>
// kernel: tpu_custom_call.1
= control target key start
LH: loop header
LB: loop body
LE: loop exit
PB: predicated region body
PF: predicated region fallthrough
CT: control target
= control target key end

     0   :  { %8 = vsyncpa [#allocation4], 0  ;;  %s976_s0 = inlined_call_operand.hbm [shape: bf16[1,768], index: 0, kind: input, shape index: {}]   ;;  %s977_s1 = inlined_call_operand.hbm [shape: bf16[768,128], index: 1, kind: input, shape index: {}]   ;;  %s978_s2 = inlined_call_operand.vmem [shape: f32[1,128], index: 2, kind: input, shape index: {}]   ;;  %s979_s3 = inlined_call_operand.hbm [shape: f32[1,128], index: 3, kind: output, shape index: {}]  }
   0x1   :  { %10 = vsyncpa [#allocation4 + $0x1], 0 }
   0x2   :  { %11 = vsyncpa [#allocation7], 0 }
   0x3   :  { %13 = vsyncpa [#allocation7 + $0x1], 0 }
   0x4   :  { %14 = vsyncpa [#allocation5], 0  ;;  %s789_s12 = smov 0   ;;  %s791_s13 = smov 0  }
   0x5   :  { %s793_s14 = smov 0   ;;  %s795_s15 = smov 0  }
   0x6 LB: > { %s808_s16 = sadd.s32 4294967295, %s760_s15   ;;  %s811_s17 = sadd.s32 1, %s760_s15   ;;  %s760_s15 = sphi %s795_s15, %s990_s15   ;;  %s756_s14 = sphi %s793_s14, %s989_s14   ;;  %s752_s13 = sphi %s791_s13, %s988_s13   ;;  %s748_s12 = sphi %s789_s12, %s987_s12  }
   0x7   : > { %s24_s18 = ssub.s32 %s760_s15, %s811_s17  ;;  %s27_s19 = sadd.s32 1, %s756_s14 }
   0x8   : > { %p25_p0 = scmp.eq.s32.totalorder %s24_s18, 0  ;;  %p34_p1 = scmp.ne.s32.totalorder %s756_s14, %s752_s13 }
   0x9   : > { %p35_p2 = scmp.eq.s32.totalorder %s760_s15, 0  ;;  %p40_p3 = scmp.ne.s32.totalorder %s752_s13, %s748_s12 }
   0xa   : > { %s821_s20 = scalar_select %p25_p0, %s756_s14, %s27_s19  }
   0xb   : > { %p36_p4 = por %p35_p2, %p34_p1  ;;  %p41_p5 = scmp.eq.s32.totalorder %s808_s16, 0 }
   0xc   : > { %p582_p6 = scmp.lt.s32.totalorder %s760_s15, 3  ;;  %s830_s22 = sand.u32 1, %s756_s14  }
   0xd   : > { %p825_p7 = por %p41_p5, %p40_p3  ;;  %s511_s23 = sshll.u32 %s830_s22, 1 }
   0xe   : > { %s543_s24 = sshll.u32 %s760_s15, 5  ;;  %s139_s28 = scalar_lea.vmem [#allocation3], %s511_s23 }
   0xf   : > { %s981_s21 = scalar_select %p825_p7, 1, 0 }
  0x10   : > { %s837_s27 = scalar_lea.hbm %s976_s0, %s543_s24  ;;  %s147_s29 = sshll.u32 %s139_s28, 4  ;;  %s839_s29 = int_to_ptr.vmem [resolvable:$true] %s147_s29 }
  0x11   : > { %p841_p8 = pnand %p582_p6, %p36_p4  ;;  %s136_s4 = scalar_lea.sflag [#allocation4], %s830_s22 }
  0x12   : > { %s638_s5 = scalar_lea.hbm %s837_s27, 32  ;;  %s643_s8 = scalar_lea.hbm %s976_s0, 96 }
  0x13   : > { %p639_p11 = scmp.ne.s32.totalorder %s837_s27, %s638_s5  ;;  %p640_p12 = pneg %p841_p8 }
  0x14   : > { %p644_p1 = scmp.lt.s32.totalorder %s837_s27, %s976_s0  ;;  %p645_p2 = scmp.lt.s32.totalorder %s643_s8, %s638_s5 }
  0x15   : > { %p641_p13 = pnand %p640_p12, %p639_p11 }
  0x16   : > { %p646_p3 = por %p645_p2, %p644_p1 }
  0x17   : > { %p642_p0 = pneg %p641_p13 }
  0x19   : > { %p647_p4 = pnand %p646_p3, %p642_p0 }
  0x1b   : > { %650 = shalt.err (!%p647_p4)
}
  0x1c   : > { %s651_s11 = scalar_lea.vmem %s839_s29, 32  ;;  %s762_s12 = smov [#allocation3]  }
  0x1d   : > { %p652_p5 = scmp.ne.s32.totalorder %s839_s29, %s651_s11  ;;  %s656_s18 = sshll.u32 %s762_s12, 4  ;;  %s657_s18 = int_to_ptr.vmem [resolvable:$false] %s656_s18 }
  0x1e   : > { %s658_s19 = scalar_lea.vmem %s657_s18, 64  ;;  %p659_p13 = scmp.lt.s32.totalorder %s839_s29, %s657_s18 }
  0x1f   : > { %p654_p6 = pnand %p652_p5, %p640_p12  ;;  %p660_p9 = scmp.lt.s32.totalorder %s658_s19, %s651_s11 }
  0x21   : > { %p655_p11 = pneg %p654_p6  ;;  %p661_p10 = por %p660_p9, %p659_p13 }
  0x23   : > { %p662_p1 = pnand %p661_p10, %p655_p11 }
  0x25   : > { %665 = shalt.err (!%p662_p1)
}
  0x26   : > { %578 = dma.hbm_to_vmem [thread:$0]  (!%p841_p8), %s837_s27, 32, %s839_s29, %s136_s4  }
  0x27   : > { %p983_p0 = scmp.lt.s32.totalorder %s760_s15, 4  ;;  %p984_p2 = scmp.ge.s32.totalorder %s760_s15, 1 }
  0x28   : > { %s514_s24 = sshll.u32 %s830_s22, 7  ;;  %s544_s25 = sshll.u32 %s760_s15, 11 }
  0x29   : > { %p876_p3 = pnand %p984_p2, %p983_p0  ;;  %s885_s5 = scalar_lea.hbm %s977_s1, %s544_s25 }
  0x2a   : > { %s158_s6 = scalar_lea.vmem [#allocation6], %s514_s24  ;;  %s155_s27 = scalar_lea.sflag [#allocation7], %s830_s22 }
  0x2b   : > { %s165_s7 = sshll.u32 %s158_s6, 4  ;;  %s666_s29 = scalar_lea.hbm %s885_s5, 2048  ;;  %s887_s7 = int_to_ptr.vmem [resolvable:$true] %s165_s7 }
  0x2c   : > { %p667_p9 = scmp.ne.s32.totalorder %s885_s5, %s666_s29  ;;  %s671_s8 = scalar_lea.hbm %s977_s1, 6144 }
  0x2d   : > { %p672_p5 = scmp.lt.s32.totalorder %s885_s5, %s977_s1  ;;  %p673_p6 = scmp.lt.s32.totalorder %s671_s8, %s666_s29 }
  0x2e   : > { %p669_p10 = pnand %p667_p9, %p640_p12 }
  0x2f   : > { %p674_p11 = por %p673_p6, %p672_p5 }
  0x30   : > { %p670_p4 = pneg %p669_p10 }
  0x32   : > { %p675_p13 = pnand %p674_p11, %p670_p4 }
  0x34   : > { %678 = shalt.err (!%p675_p13)
}
  0x35   : > { %s679_s11 = scalar_lea.vmem %s887_s7, 2048  ;;  %s763_s12 = smov [#allocation6]  }
  0x36   : > { %p680_p1 = scmp.ne.s32.totalorder %s887_s7, %s679_s11  ;;  %s684_s18 = sshll.u32 %s763_s12, 4  ;;  %s685_s18 = int_to_ptr.vmem [resolvable:$false] %s684_s18 }
  0x37   : > { %s686_s19 = scalar_lea.vmem %s685_s18, 4096  ;;  %p687_p9 = scmp.lt.s32.totalorder %s887_s7, %s685_s18 }
  0x38   : > { %p682_p0 = pnand %p680_p1, %p640_p12  ;;  %p688_p10 = scmp.lt.s32.totalorder %s686_s19, %s679_s11 }
  0x3a   : > { %p683_p2 = pneg %p682_p0  ;;  %p689_p7 = por %p688_p10, %p687_p9 }
  0x3c   : > { %p690_p5 = pnand %p689_p7, %p683_p2 }
  0x3e   : > { %693 = shalt.err (!%p690_p5)
}
  0x3f   : > { %s764_s24 = smov 64   ;;  %s765_s25 = smov 4  }
  0x40   : > { %581 = dma.hbm_to_vmem [thread:$0]  (!%p841_p8), %s885_s5, 2048, %s887_s7, %s155_s27, %s764_s24, %s764_s24, %s765_s25  }
  0x41   : > { %177 = sbr.rel (%p876_p3) target bundleno = 341 (0x155), region = 32  ;;  %s179_s26 = sand.u32 (!%p876_p3), 1, %s752_s13  }
  0x42   : > { %s518_s28 = sshll.u32 (!%p876_p3), %s179_s26, 1  ;;  %s180_s6 = scalar_lea.sflag (!%p876_p3), [#allocation4], %s179_s26 }
  0x43   : > { %s917_s29 = scalar_lea.vmem (!%p876_p3), [#allocation3], %s518_s28  ;;  %p986_p7 = scmp.ne.s32.totalorder (!%p876_p3), %s981_s21, 0 }
  0x46   : > { %735 = dma.done.wait (%p986_p7), %s180_s6, 32  }
  0x47   : > { %737 = vsyncadd (%p986_p7), %s180_s6, 4294967264  ;;  %s519_s15 = sshll.u32 %s179_s26, 7  ;;  %s189_s30 = scalar_lea.sflag [#allocation7], %s179_s26 }
  0x48   : > { %s923_s22 = scalar_lea.vmem [#allocation6], %s519_s15 }
  0x49   : > { %739 = dma.done.wait (%p986_p7), %s189_s30, 2048  }
  0x4a   : > { %741 = vsyncadd (%p986_p7), %s189_s30, 4294965248  ;;  %p520_p8 = scmp.ne.s32.totalorder %s808_s16, 0 }
  0x4c   : > { %221 = sbr.rel (%p520_p8) target bundleno = 83 (0x53), region = 44 }
  0x51   : > { %v766_v0 = vmov 0.0  }
  0x52   : > { %222 = vst [vmem:[#allocation2] sm:$0x1] %v766_v0 }
  0x53 PF: > { %v622_v1 = vld [vmem:[%s923_s22 + $0x78] sm:$0xff]   ;;  %v624_v3 = vld [vmem:[%s923_s22 + $0x70] sm:$0xff]   ;;  %v626_v5 = vld [vmem:[%s923_s22 + $0x68] sm:$0xff]   ;;  %v269_v10 = vlaneseq  ;;  %v767_v14 = vmov 1966171168   ;;  %p538_p12 = scmp.ne.s32.totalorder %s808_s16, 2 }
  0x54   : > { %v623_v2 = vld [vmem:[%s923_s22 + $0x38] sm:$0xff]   ;;  %545 = vmatprep.subr.bf16.mxu0 %v622_v1  ;;  %v625_v4 = vld [vmem:[%s923_s22 + $0x30] sm:$0xff]   ;;  %v627_v6 = vld [vmem:[%s923_s22 + $0x28] sm:$0xff]   ;;  %v267_v15 = vunpack.c.l.s4 %v767_v14 }
  0x55   : > { %546 = vmatpush3.bf16.msra.mxu0 %v623_v2  ;;  %v628_v7 = vld [vmem:[%s923_s22 + $0x60] sm:$0xff]   ;;  %v630_v9 = vld [vmem:[%s923_s22 + $0x58] sm:$0xff]   ;;  %v632_v12 = vld [vmem:[%s923_s22 + $0x50] sm:$0xff]   ;;  %v270_v16 = vshrl.u32 %v269_v10, 7 }
  0x56   : > { %547 = vmatprep.subr.bf16.mxu0 %v624_v3  ;;  %v629_v8 = vld [vmem:[%s923_s22 + $0x20] sm:$0xff]   ;;  %v631_v11 = vld [vmem:[%s923_s22 + $0x18] sm:$0xff]   ;;  %v633_v17 = vld [vmem:[%s923_s22 + $0x10] sm:$0xff]   ;;  %v268_v19 = vunpack.c.0.s8 %v267_v15 }
  0x57   : > { %v521_v13 = vld.sshfl [vmem:[%s917_s29] sm:$0x11 pattern:$0x75316420]  ;;  %v634_v20 = vld [vmem:[%s923_s22 + $0x48] sm:$0xff]   ;;  %v636_v24 = vld [vmem:[%s923_s22 + $0x40] sm:$0xff]  }
  0x58   : > { %v265_v18 = vcombine.high %v521_v13, %v521_v13  ;;  %v271_v21 = vsub.s32 %v268_v19, %v270_v16  ;;  %v635_v22 = vld [vmem:[%s923_s22 + $0x8] sm:$0xff]   ;;  %v637_v25 = vld [vmem:[%s923_s22] sm:$0xff]  }
  0x59   : > { %548 = vmatpush3.bf16.msra.mxu0 %v625_v4  ;;  %v223_v28 = vld [vmem:[#allocation2] sm:$0x1] }
  0x5a   : > { %549 = vmatprep.subr.bf16.mxu0 %v626_v5  ;;  %v279_v23 = vrot.slane %v265_v18, %v271_v21  ;;  %v272_v26 = vrot.slane %v521_v13, %v271_v21 }
  0x5c   : > { %410 = vmatprep.mubr.bf16.mxu0 %v279_v23 }
  0x5d   : > { %550 = vmatpush3.bf16.msra.mxu0 %v627_v6 }
  0x5e   : > { %551 = vmatprep.subr.bf16.mxu0 %v628_v7 }
  0x61   : > { %552 = vmatpush3.bf16.msra.mxu0 %v629_v8 }
  0x62   : > { %553 = vmatprep.subr.bf16.mxu0 %v630_v9 }
  0x65   : > { %554 = vmatpush3.bf16.msra.mxu0 %v631_v11 }
  0x66   : > { %555 = vmatprep.subr.bf16.mxu0 %v632_v12 }
  0x69   : > { %556 = vmatpush3.bf16.msra.mxu0 %v633_v17 }
  0x6a   : > { %557 = vmatprep.subr.bf16.mxu0 %v634_v20 }
  0x6d   : > { %558 = vmatpush3.bf16.msra.mxu0 %v635_v22 }
  0x6e   : > { %559 = vmatprep.subr.bf16.mxu0 %v636_v24 }
  0x71   : > { %560 = vmatpush3.bf16.msra.mxu0 %v637_v25 }
  0x74   : > { %411 = vmatmul.mubr.bf16.vlgmr.msra.gmra.mxu0 %v272_v26 }
 0x134   : > { %v561_v27 = vpop.f32.mrf.mxu0 }
 0x136   : > { %v562_v29 = vpop.f32.mrf.mxu0 }
 0x137   : > { %v563_v30 = vadd.f32 %v562_v29, %v561_v27  ;;  %423 = sbr.rel (%p538_p12) target bundleno = 326 (0x146), region = 48 }
 0x138   : > { %v564_v31 = vpop.f32.mrf.mxu0 }
 0x139   : > { %v418_v32 = vadd.f32 %v563_v30, %v223_v28 }
 0x13a   : > { %v565_v33 = vpop.f32.mrf.mxu0 }
 0x13b   : > { %419 = vst [vmem:[#allocation2] sm:$0x1] %v418_v32 }
 0x13c   : > { %v425_v35 = vld [vmem:[%s978_s2] sm:$0x1] }
 0x142   : > { %v424_v34 = vld [vmem:[#allocation2] sm:$0x1] }
 0x143   : > { %v426_v36 = vadd.f32 %v425_v35, %v424_v34 }
 0x145   : > { %427 = vst [vmem:[#allocation8] sm:$0x1] %v426_v36 }
 0x146 PF: > { %p583_p3 = scmp.eq.s32.totalorder %s808_s16, 2  ;;  %s768_s5 = smov [#allocation8]  }
 0x147   : > { %s435_s7 = sshll.u32 %s768_s5, 4  ;;  %s436_s7 = int_to_ptr.vmem [resolvable:$true] %s435_s7 }
 0x148   : > { %s694_s27 = scalar_lea.vmem %s436_s7, 16  ;;  %s700_s4 = scalar_lea.vmem %s436_s7, 32 }
 0x149   : > { %p695_p4 = scmp.ne.s32.totalorder %s436_s7, %s694_s27  ;;  %p701_p13 = scmp.lt.s32.totalorder %s436_s7, %s436_s7 }
 0x14a   : > { %p702_p1 = scmp.lt.s32.totalorder %s700_s4, %s694_s27 }
 0x14b   : > { %p696_p6 = pnand %p695_p4, %p583_p3 }
 0x14c   : > { %p703_p0 = por %p702_p1, %p701_p13 }
 0x14d   : > { %p697_p11 = pneg %p696_p6 }
 0x14f   : > { %p704_p2 = pnand %p703_p0, %p697_p11 }
 0x151   : > { %707 = shalt.err (!%p704_p2)
}
 0x152   : > { %572 = dma.vmem_to_hbm [thread:$0]  (%p583_p3), %s436_s7, 16, %s979_s3, [#allocation5]  }
 0x153   : > { %743 = dma.done.wait (%p583_p3), [#allocation5], 16  }
 0x154   : > { %745 = vsyncadd (%p583_p3), [#allocation5], 4294967280 }
 0x155 PF: > { %p17_p9 = scmp.ge.s32.totalorder %s811_s17, 5   ;;  %s987_s12 = smov %s752_s13 }
 0x156   : > { %s988_s13 = smov %s756_s14  ;;  %s989_s14 = smov %s821_s20 }
 0x157   : > { %s990_s15 = smov %s811_s17  ;;  %19 = sbr.rel (!%p17_p9) target bundleno = 6 (0x6), region = 90 }
 0x15c   :  { %448 = vsyncpa [#allocation4], 1 }
 0x15d   :  { %450 = vsyncpa [#allocation4 + $0x1], 1 }
 0x15e   :  { %451 = vsyncpa [#allocation7], 1 }
 0x15f   :  { %453 = vsyncpa [#allocation7 + $0x1], 1 }
 0x160   :  { %454 = vsyncpa [#allocation5], 1 }
 0x161   :  { %456 = vsyncpa [#allocation5 + $0x1], 1 }

</bundles_post_ra>
